<compile_context>
chip_gen: v7x
topology: tpu7x:2x2x1
jax: 0.10.0
libtpu: 0.0.40
codegen_flags: <defaults>
</compile_context>

<pallas_src>
import functools

import jax
import jax.numpy as jnp
from jax.experimental import pallas as pl
from jax.experimental.pallas import tpu as pltpu


LANE = 128
_DEFAULT_VMEM_LIMIT = 32 * 1024 * 1024      # safe on every generation
_STREAM_MIN_ELEMS = 64 * 1024                # below this -> fused small-param kernel
_SMALL_MAX_BYTES = 4 * 1024 * 1024           # per-array cap for the fused small kernel
_SMALL_FUSE_BUDGET = 8 * 1024 * 1024         # total VMEM budget per fused launch
_STREAM_BLOCK_BYTES = 4 * 1024 * 1024        # ~4 MiB blocks: DMA >> 0.35us step overhead


@functools.lru_cache(maxsize=None)
def _vmem_limit():
    """Per-generation scoped-VMEM limit (>=32 MiB, up to 64 MiB on big-VMEM chips)."""
    try:
        cap = int(pltpu.get_tpu_info().vmem_capacity_bytes)
        return max(_DEFAULT_VMEM_LIMIT, min(cap * 3 // 4, 64 * 1024 * 1024))
    except Exception:
        return _DEFAULT_VMEM_LIMIT


@functools.lru_cache(maxsize=None)
def _num_tensorcores():
    """Best-effort TensorCore count for the leading 'parallel' axis (harmless if wrong)."""
    try:
        info = pltpu.get_tpu_info()
        for name in ("num_cores", "core_count", "num_tensorcores"):
            v = getattr(info, name, None)
            if isinstance(v, int) and v >= 1:
                return min(v, 2)
    except Exception:
        pass
    # TODO(synk): switch to pltpu.CORE_PARALLEL / pl.core_map once its behaviour on
    # single-TC chips is verified; a size-2 "parallel" axis is always safe & correct.
    return 2


# ----------------------------------------------------------------------------
# Kernel 1: Linear forward  y = x @ W + b   (the wrapped module's forward)
# ----------------------------------------------------------------------------
def _linear_kernel(x_ref, w_ref, b_ref, o_ref, acc_ref):
    k = pl.program_id(2)

    @pl.when(k == 0)
    def _():
        acc_ref[...] = jnp.zeros_like(acc_ref)

    acc_ref[...] += jnp.dot(x_ref[...], w_ref[...],
                            preferred_element_type=jnp.float32)

    @pl.when(k == pl.num_programs(2) - 1)
    def _():
        o_ref[...] = (acc_ref[...] + b_ref[...].astype(jnp.float32)).astype(o_ref.dtype)


def _pick_tile(dim, pref):
    # Prefer MXU-friendly tiles (256 for v6e/v7x 256x256 MXU); fall back to the
    # full dim for small / odd layers.
    for t in (pref, 256, 128):
        if t <= dim and dim % t == 0:
            return t
    return dim


def _shrink_tiles_for_vmem(tm, tn, tk, itemsize, budget):
    """Keep double-buffered tiles + accumulator under the scoped VMEM budget.

    Halving an even tile preserves divisibility of the corresponding dim.
    """
    def need(a, b, c):
        return 2 * (a * c + c * b) * itemsize + 2 * a * b * itemsize + a * b * 4

    while need(tm, tn, tk) > budget:
        if tk > 128 and tk % 2 == 0:
            tk //= 2
        elif tn > 128 and tn % 2 == 0:
            tn //= 2
        elif tm > 8 and tm % 2 == 0:
            tm //= 2
        else:
            # TODO(synk): huge odd dims would need wrapper-side padding to tile cleanly.
            break
    return tm, tn, tk


def linear_forward(x, w, b, *, tm=256, tn=256, tk=512):
    B, Hin = x.shape
    Hout = w.shape[1]
    tm = _pick_tile(B, tm)
    tn = _pick_tile(Hout, tn)
    tk = _pick_tile(Hin, tk)
    tm, tn, tk = _shrink_tiles_for_vmem(tm, tn, tk, x.dtype.itemsize,
                                        int(_vmem_limit() * 0.7))
    grid = (B // tm, Hout // tn, Hin // tk)
    return pl.pallas_call(
        _linear_kernel,
        out_shape=jax.ShapeDtypeStruct((B, Hout), x.dtype),
        grid_spec=pltpu.PrefetchScalarGridSpec(
            num_scalar_prefetch=0,
            grid=grid,
            in_specs=[
                pl.BlockSpec((tm, tk), lambda i, j, k: (i, k)),
                pl.BlockSpec((tk, tn), lambda i, j, k: (k, j)),
                pl.BlockSpec((1, tn), lambda i, j, k: (0, j)),
            ],
            out_specs=pl.BlockSpec((tm, tn), lambda i, j, k: (i, j)),
            scratch_shapes=[pltpu.VMEM((tm, tn), jnp.float32)],
        ),
        compiler_params=pltpu.CompilerParams(
            dimension_semantics=("parallel", "parallel", "arbitrary"),
            vmem_limit_bytes=_vmem_limit(),
        ),
    )(x, w, b.reshape(1, Hout))


# ----------------------------------------------------------------------------
# Kernel 2a: streaming all-finite reduction for large gradients
# ----------------------------------------------------------------------------
def _all_finite_stream_kernel(g_ref, o_ref, acc_ref, *, rows_total, block_rows,
                              num_tiles, tiles_per_core, has_ragged):
    c = pl.program_id(0)   # core partial ("parallel" axis)
    t = pl.program_id(1)   # sequential row-block axis

    @pl.when(t == 0)
    def _():
        acc_ref[...] = jnp.zeros_like(acc_ref)

    x = g_ref[...]
    # NaN-propagating accumulate: finite -> 0, Inf/NaN -> NaN.  One VPU op per
    # element in the native dtype; reduced along the sublane axis so the
    # accumulator RMW is a single (1, C) row instead of the whole tile.
    zeros = x * 0.0

    if has_ragged:
        blk = jnp.minimum(c * tiles_per_core + t, num_tiles - 1)
        is_last = blk == (num_tiles - 1)

        @pl.when(jnp.logical_not(is_last))
        def _():
            acc_ref[...] += jnp.sum(zeros, axis=0, keepdims=True).astype(jnp.float32)

        @pl.when(is_last)
        def _():
            # OOB rows of the ragged last block hold arbitrary VMEM contents;
            # select them to 0 before the NaN-propagating accumulate.  Clamped
            # duplicate tiles also resolve to the last block and are masked here.
            ridx = jax.lax.broadcasted_iota(jnp.int32, x.shape, 0) + blk * block_rows
            zm = jnp.where(ridx < rows_total, zeros, jnp.zeros_like(zeros))
            acc_ref[...] += jnp.sum(zm, axis=0, keepdims=True).astype(jnp.float32)
    else:
        acc_ref[...] += jnp.sum(zeros, axis=0, keepdims=True).astype(jnp.float32)

    @pl.when(t == tiles_per_core - 1)
    def _():
        flag = jnp.all(jnp.isfinite(acc_ref[...])).astype(jnp.int32)
        o_ref[...] = jnp.full(o_ref.shape, flag, jnp.int32)


def _stream_lane_cols(g):
    """Lane width for a copy-free 2D view of the flattened gradient (or None)."""
    n = int(g.size)
    for cols in (4 * LANE, 2 * LANE, LANE):
        if n % cols == 0:
            return cols
    if g.ndim >= 2 and LANE <= g.shape[-1] <= 8192:
        return int(g.shape[-1])   # lane-unaligned but still copy-free
    return None


def _all_finite_stream(g):
    cols = _stream_lane_cols(g)
    g2d = g.reshape(-1, cols)              # row-major bitcast reshape: no HBM copy
    R = g2d.shape[0]
    itemsize = g2d.dtype.itemsize

    br = max(8, (_STREAM_BLOCK_BYTES // (cols * itemsize)) // 8 * 8)
    block_rows = R if br >= R else br      # full dim if the grad fits one block
    num_tiles = pl.cdiv(R, block_rows)
    ncores = _num_tensorcores() if num_tiles >= 2 else 1
    tpc = pl.cdiv(num_tiles, ncores)
    max_blk = num_tiles - 1
    has_ragged = (R % block_rows) != 0

    kernel = functools.partial(
        _all_finite_stream_kernel,
        rows_total=R, block_rows=block_rows, num_tiles=num_tiles,
        tiles_per_core=tpc, has_ragged=has_ragged)

    out = pl.pallas_call(
        kernel,
        out_shape=jax.ShapeDtypeStruct((ncores, 8, LANE), jnp.int32),
        grid_spec=pltpu.PrefetchScalarGridSpec(
            num_scalar_prefetch=0,
            grid=(ncores, tpc),
            in_specs=[pl.BlockSpec(
                (block_rows, cols),
                # clamp duplicated tail tiles in-bounds; the in-kernel ragged
                # mask (or full-block idempotence) neutralizes them.
                lambda c, t: (jnp.minimum(c * tpc + t, max_blk), 0))],
            out_specs=pl.BlockSpec((1, 8, LANE), lambda c, t: (c, 0, 0)),
            scratch_shapes=[pltpu.VMEM((1, cols), jnp.float32)],
        ),
        compiler_params=pltpu.CompilerParams(
            dimension_semantics=("parallel", "arbitrary"),
            vmem_limit_bytes=_vmem_limit(),
        ),
    )(g2d)
    return jnp.min(out).astype(jnp.int32)


# ----------------------------------------------------------------------------
# Kernel 2b: fused all-finite check for many small gradients in ONE launch
# ----------------------------------------------------------------------------
def _all_finite_fused_kernel(*refs):
    in_refs, o_ref = refs[:-1], refs[-1]
    flag = jnp.int32(1)
    for r in in_refs:
        flag = flag & jnp.all(jnp.isfinite(r[...])).astype(jnp.int32)
    o_ref[...] = jnp.full(o_ref.shape, flag, jnp.int32)


def _all_finite_small_fused(grads):
    # Free 2D collapse of each grad (row-major reshape, no copy).
    gs2d = [g.reshape(-1, g.shape[-1]) if g.ndim >= 1 else g.reshape(1, 1)
            for g in grads]
    out = pl.pallas_call(
        _all_finite_fused_kernel,
        out_shape=jax.ShapeDtypeStruct((8, LANE), jnp.int32),
        grid=(1,),
        in_specs=[pl.BlockSpec(g.shape, lambda i: (0, 0)) for g in gs2d],
        out_specs=pl.BlockSpec((8, LANE), lambda i: (0, 0)),
        compiler_params=pltpu.CompilerParams(vmem_limit_bytes=_vmem_limit()),
    )(*gs2d)
    return out[0, 0]


def _chunks_by_bytes(arrays, budget):
    chunk, used = [], 0
    for a in arrays:
        b = int(a.size) * a.dtype.itemsize
        if chunk and used + b > budget:
            yield chunk
            chunk, used = [], 0
        chunk.append(a)
        used += b
    if chunk:
        yield chunk


def all_finite_many(grads):
    """Device int32 scalar: 1 iff every element of every gradient is finite."""
    flags, small = [], []
    for g in grads:
        if g is None:
            continue
        g = jnp.asarray(g)
        if g.size == 0 or not jnp.issubdtype(g.dtype, jnp.floating):
            continue  # integer / empty grads are trivially finite
        nbytes = int(g.size) * g.dtype.itemsize
        if g.size >= _STREAM_MIN_ELEMS and _stream_lane_cols(g) is not None:
            flags.append(_all_finite_stream(g))
        elif nbytes <= _SMALL_MAX_BYTES:
            small.append(g)
        else:
            # TODO(synk): rare large grads with no copy-free lane-dense 2D view
            # fall back to a fused XLA reduction instead of a Pallas kernel.
            flags.append(jnp.isfinite(g).all().astype(jnp.int32))
    for chunk in _chunks_by_bytes(small, _SMALL_FUSE_BUDGET):
        flags.append(_all_finite_small_fused(chunk))
    if not flags:
        return jnp.ones((), jnp.int32)
    if len(flags) == 1:
        return flags[0].reshape(()).astype(jnp.int32)
    return jnp.min(jnp.stack([f.reshape(()) for f in flags])).astype(jnp.int32)


def all_finite(g):
    """== param.grad.isfinite().all() for a single gradient."""
    return all_finite_many([g])


# ----------------------------------------------------------------------------
# A tiny wrapped module (deterministic init) whose forward runs the Pallas kernel
# ----------------------------------------------------------------------------
class LinearModule:
    def __init__(self, in_features=32, out_features=32, key=None):
        key = jax.random.PRNGKey(0) if key is None else key
        kw, kb, kg = jax.random.split(key, 3)
        self.w = jax.random.normal(kw, (in_features, out_features), jnp.float32) * 0.02
        self.b = jax.random.normal(kb, (out_features,), jnp.float32) * 0.02
        # synthetic "gradients" (what HF Trainer would have populated)
        self.grads = {
            "w": jax.random.normal(kg, self.w.shape, jnp.float32),
            "b": jnp.ones_like(self.b),
        }

    def forward(self, x):
        return linear_forward(x, self.w, self.b)

    def zero_grad(self, set_to_none=False):
        if set_to_none:
            self.grads = {k: None for k in self.grads}
        else:
            self.grads = {"w": jnp.zeros_like(self.w), "b": jnp.zeros_like(self.b)}


# ----------------------------------------------------------------------------
# IgnoreGradManipulations: same delegation semantics as the PyTorch wrapper
# ----------------------------------------------------------------------------
class IgnoreGradManipulations:
    """Blocks gradient manipulations (zero_grad / clip_grad_norm_) of the wrapped module."""

    def __init__(self, module, override_clipping=True, override_zero_grad=True):
        self.module = module
        self.override_clipping = override_clipping
        self.override_zero_grad = override_zero_grad

    def forward(self, *args, **kwargs):
        return self.module.forward(*args, **kwargs)   # pure pass-through

    def __call__(self, *args, **kwargs):
        return self.forward(*args, **kwargs)

    def zero_grad(self, set_to_none=False):
        if self.override_zero_grad:
            # all(param.grad.isfinite().all() for param in parameters()), fused:
            # small params share one launch, flags AND'ed on device, ONE host copy.
            grads = [g for g in self.module.grads.values() if g is not None]
            grad_is_finite = bool(all_finite_many(grads))
            if grad_is_finite:
                pass  # "Successfully bypassed zero_grad"
            else:
                self.module.zero_grad(set_to_none=set_to_none)
        else:
            self.module.zero_grad(set_to_none=set_to_none)

    def clip_grad_norm_(self, max_norm, norm_type=2):
        if self.override_clipping:
            return None  # "Successfully bypassed clip_grad_norm_"
        # TODO(synk): non-bypassed clip_grad_norm_ (global-norm clip) not implemented.
        return None

    def no_sync(self):
        # TODO(synk): DistributedDataParallel.no_sync has no single-device Pallas equivalent.
        return None


if __name__ == "__main__":
    batch, hidden = 8, 32
    key = jax.random.PRNGKey(0)
    kx, kmod, kbig, kodd = jax.random.split(key, 4)
    x = jax.random.normal(kx, (batch, hidden), jnp.float32)

    inner = LinearModule(in_features=hidden, out_features=hidden, key=kmod)
    wrapped = IgnoreGradManipulations(inner)

    # forward (pass-through -> Pallas tiled matmul kernel)
    y = wrapped(x)
    jax.block_until_ready(y)
    y_ref = x @ inner.w + inner.b
    assert jnp.allclose(y, y_ref, atol=1e-5, rtol=1e-5), "linear kernel mismatch"

    # zero_grad bypass path: finite grads -> grads untouched (fused small kernel)
    w_grad_before = inner.grads["w"]
    wrapped.zero_grad()
    assert inner.grads["w"] is not None
    assert jnp.allclose(inner.grads["w"], w_grad_before), "bypass modified grads"

    # non-finite grads -> falls through to module.zero_grad
    inner.grads["w"] = inner.grads["w"].at[0, 0].set(jnp.nan)
    assert int(all_finite(inner.grads["w"])) == 0
    wrapped.zero_grad(set_to_none=False)
    assert jnp.all(inner.grads["w"] == 0.0)

    # streaming kernel: single lane-dense block, no wrapper-side pad/copy
    big = jax.random.normal(kbig, (600, 512), jnp.float32)
    assert int(all_finite(big)) == 1
    assert int(all_finite(big.at[599, 511].set(jnp.inf))) == 0

    # streaming kernel: multi-block + ragged last block + clamped duplicate tile
    big2 = jax.random.normal(kbig, (4104, 512), jnp.float32)
    assert int(all_finite(big2)) == 1
    assert int(all_finite(big2.at[0, 0].set(jnp.nan))) == 0
    assert int(all_finite(big2.at[4103, 511].set(jnp.inf))) == 0   # in the ragged block

    # streaming kernel in bf16 (native-dtype accumulate), ragged path
    bf = jax.random.normal(kbig, (8200, 512), jnp.float32).astype(jnp.bfloat16)
    assert int(all_finite(bf)) == 1
    assert int(all_finite(bf.at[8199, 0].set(jnp.inf))) == 0

    # fused small-param kernel: odd 1-D grad, no padding copy
    odd = jax.random.normal(kodd, (37,), jnp.float32)
    assert int(all_finite(odd)) == 1
    assert int(all_finite(odd.at[36].set(jnp.nan))) == 0

    # clip bypass
    assert wrapped.clip_grad_norm_(1.0) is None

    print("KERNEL_OK")
</pallas_src>

<mosaic_0001>
module attributes {stable_mosaic.version = 11 : i64} {
  func.func @_linear_kernel(%arg0: i32, %arg1: i32, %arg2: i32, %arg3: memref<8x32xf32, #tpu.memory_space<vmem>>, %arg4: memref<32x32xf32, #tpu.memory_space<vmem>>, %arg5: memref<1x32xf32, #tpu.memory_space<vmem>>, %arg6: memref<8x32xf32, #tpu.memory_space<vmem>>, %arg7: memref<8x32xf32, #tpu.memory_space<vmem>>) attributes {dimension_semantics = [#tpu.dimension_semantics<parallel>, #tpu.dimension_semantics<parallel>, #tpu.dimension_semantics<arbitrary>], iteration_bounds = array<i64: 1, 1, 1>, scalar_prefetch = 0 : i64, scratch_operands = 1 : i64, tpu.core_type = #tpu.core_type<tc>, window_params = [{transform_indices = @transform_0, window_bounds = array<i64: 8, 32>}, {transform_indices = @transform_1, window_bounds = array<i64: 32, 32>}, {transform_indices = @transform_2, window_bounds = array<i64: 1, 32>}, {transform_indices = @transform_3, window_bounds = array<i64: 8, 32>}]} {
    %c0_i32 = arith.constant 0 : i32
    %0 = arith.cmpi eq, %arg2, %c0_i32 : i32
    %1 = arith.extui %0 : i1 to i32
    %c0_i32_0 = arith.constant 0 : i32
    %2 = arith.cmpi ne, %1, %c0_i32_0 : i32
    scf.if %2 {
      %cst_10 = arith.constant 0.000000e+00 : f32
      %12 = vector.broadcast %cst_10 : f32 to vector<8x32xf32>
      %c0_11 = arith.constant 0 : index
      %c0_12 = arith.constant 0 : index
      %13 = vector.load %arg7[%c0_11, %c0_12] : memref<8x32xf32, #tpu.memory_space<vmem>>, vector<8x32xf32>
      tpu.vector_store %arg7[%c0_11, %c0_12], %12 {strides = array<i32>} : memref<8x32xf32, #tpu.memory_space<vmem>>, vector<8x32xf32>,
    } else {
    }
    %c0 = arith.constant 0 : index
    %c0_1 = arith.constant 0 : index
    %3 = vector.load %arg7[%c0, %c0_1] : memref<8x32xf32, #tpu.memory_space<vmem>>, vector<8x32xf32>
    %c0_2 = arith.constant 0 : index
    %c0_3 = arith.constant 0 : index
    %4 = vector.load %arg3[%c0_2, %c0_3] : memref<8x32xf32, #tpu.memory_space<vmem>>, vector<8x32xf32>
    %c0_4 = arith.constant 0 : index
    %c0_5 = arith.constant 0 : index
    %5 = vector.load %arg4[%c0_4, %c0_5] : memref<32x32xf32, #tpu.memory_space<vmem>>, vector<32x32xf32>
    %cst = arith.constant dense<0.000000e+00> : vector<8x32xf32>
    %6 = tpu.matmul %4, %5, %cst {dimension_numbers = #tpu.dot_dimension_numbers<[1], [0], [0], [1], [0, 0, 1, 1], [], []>} : vector<8x32xf32>, vector<32x32xf32>, vector<8x32xf32> -> vector<8x32xf32>
    %7 = arith.addf %3, %6 : vector<8x32xf32>
    %c0_6 = arith.constant 0 : index
    %c0_7 = arith.constant 0 : index
    %8 = vector.load %arg7[%c0_6, %c0_7] : memref<8x32xf32, #tpu.memory_space<vmem>>, vector<8x32xf32>
    tpu.vector_store %arg7[%c0_6, %c0_7], %7 {strides = array<i32>} : memref<8x32xf32, #tpu.memory_space<vmem>>, vector<8x32xf32>,
    %c0_i32_8 = arith.constant 0 : i32
    %9 = arith.cmpi eq, %arg2, %c0_i32_8 : i32
    %10 = arith.extui %9 : i1 to i32
    %c0_i32_9 = arith.constant 0 : i32
    %11 = arith.cmpi ne, %10, %c0_i32_9 : i32
    scf.if %11 {
      %c0_10 = arith.constant 0 : index
      %c0_11 = arith.constant 0 : index
      %12 = vector.load %arg7[%c0_10, %c0_11] : memref<8x32xf32, #tpu.memory_space<vmem>>, vector<8x32xf32>
      %c0_12 = arith.constant 0 : index
      %c0_13 = arith.constant 0 : index
      %13 = vector.load %arg5[%c0_12, %c0_13] : memref<1x32xf32, #tpu.memory_space<vmem>>, vector<1x32xf32>
      %14 = vector.broadcast %13 : vector<1x32xf32> to vector<8x32xf32>
      %15 = arith.addf %12, %14 : vector<8x32xf32>
      %c0_14 = arith.constant 0 : index
      %c0_15 = arith.constant 0 : index
      %16 = vector.load %arg6[%c0_14, %c0_15] : memref<8x32xf32, #tpu.memory_space<vmem>>, vector<8x32xf32>
      tpu.vector_store %arg6[%c0_14, %c0_15], %15 {strides = array<i32>} : memref<8x32xf32, #tpu.memory_space<vmem>>, vector<8x32xf32>,
    } else {
    }
    return
  }
  func.func @transform_0(%arg0: i32, %arg1: i32, %arg2: i32) -> (i32, i32) {
    %c0_i32 = arith.constant 0 : i32
    return %arg0, %arg2 : i32, i32
  }
  func.func @transform_1(%arg0: i32, %arg1: i32, %arg2: i32) -> (i32, i32) {
    %c0_i32 = arith.constant 0 : i32
    return %arg2, %arg1 : i32, i32
  }
  func.func @transform_2(%arg0: i32, %arg1: i32, %arg2: i32) -> (i32, i32) {
    %c0_i32 = arith.constant 0 : i32
    %c0_i32_0 = arith.constant 0 : i32
    return %c0_i32, %arg1 : i32, i32
  }
  func.func @transform_3(%arg0: i32, %arg1: i32, %arg2: i32) -> (i32, i32) {
    %c0_i32 = arith.constant 0 : i32
    return %arg0, %arg1 : i32, i32
  }
}

</mosaic_0001>

<bundles_post_ra>
// kernel: tpu_custom_call.1
= control target key start
LH: loop header
LB: loop body
LE: loop exit
PB: predicated region body
PF: predicated region fallthrough
CT: control target
= control target key end

     0   :  { %8 = vsyncpa [#allocation4], 0  ;;  %s340_s0 = inlined_call_operand.hbm [shape: f32[8,32], index: 0, kind: input, shape index: {}]   ;;  %s341_s1 = inlined_call_operand.hbm [shape: f32[32,32], index: 1, kind: input, shape index: {}]   ;;  %s342_s2 = inlined_call_operand.vmem [shape: f32[1,32], index: 2, kind: input, shape index: {}]   ;;  %s343_s3 = inlined_call_operand.hbm [shape: f32[8,32], index: 3, kind: output, shape index: {}]  }
   0x1   :  { %9 = vsyncpa [#allocation7], 0 }
   0x2   :  { %10 = vsyncpa [#allocation5], 0  ;;  %s262_s12 = smov [#allocation3]   ;;  %s263_s14 = smov [#allocation6]  }
   0x3   :  { %s17_s13 = sshll.u32 %s262_s12, 4  ;;  %s26_s15 = sshll.u32 %s263_s14, 4  ;;  %s18_s13 = int_to_ptr.vmem [resolvable:$true] %s17_s13  ;;  %s290_s15 = int_to_ptr.vmem [resolvable:$true] %s26_s15 }
   0x4   :  { %s190_s18 = scalar_lea.hbm %s340_s0, 128 }
   0x5   :  { %p191_p0 = scmp.ne.s32.totalorder %s340_s0, %s190_s18  ;;  %p194_p1 = scmp.lt.u32.totalorder %s190_s18, %s340_s0 }
   0x7   :  { %p196_p2 = pnand %p194_p1, %p191_p0 }
   0x9   :  { %199 = shalt.err (!%p196_p2)
}
   0xa   :  { %s200_s23 = scalar_lea.vmem %s18_s13, 128  ;;  %p205_p4 = scmp.lt.s32.totalorder %s18_s13, %s18_s13 }
   0xb   :  { %p201_p3 = scmp.ne.s32.totalorder %s18_s13, %s200_s23  ;;  %p206_p5 = scmp.lt.s32.totalorder %s200_s23, %s200_s23 }
   0xd   :  { %p207_p6 = por %p206_p5, %p205_p4 }
   0xf   :  { %p208_p7 = pnand %p207_p6, %p201_p3 }
  0x11   :  { %211 = shalt.err (!%p208_p7)
}
  0x12   :  { %20 = dma.hbm_to_vmem [thread:$0]  %s340_s0, 128, %s18_s13, [#allocation4]  }
  0x13   :  { %s212_s28 = scalar_lea.hbm %s341_s1, 512 }
  0x14   :  { %p213_p8 = scmp.ne.s32.totalorder %s341_s1, %s212_s28  ;;  %p216_p9 = scmp.lt.u32.totalorder %s212_s28, %s341_s1 }
  0x16   :  { %p218_p10 = pnand %p216_p9, %p213_p8 }
  0x18   :  { %221 = shalt.err (!%p218_p10)
}
  0x19   :  { %s222_s6 = scalar_lea.vmem %s290_s15, 512  ;;  %p227_p12 = scmp.lt.s32.totalorder %s290_s15, %s290_s15 }
  0x1a   :  { %p223_p11 = scmp.ne.s32.totalorder %s290_s15, %s222_s6  ;;  %p228_p13 = scmp.lt.s32.totalorder %s222_s6, %s222_s6 }
  0x1c   :  { %p229_p0 = por %p228_p13, %p227_p12 }
  0x1e   :  { %p230_p1 = pnand %p229_p0, %p223_p11 }
  0x20   :  { %233 = shalt.err (!%p230_p1)
}
  0x21   :  { %s264_s0 = smov 128   ;;  %s265_s7 = smov 8  }
  0x22   :  { %32 = dma.hbm_to_vmem [thread:$0]  %s341_s1, 512, %s290_s15, [#allocation7], %s264_s0, %s264_s0, %s265_s7  }
  0x23   :  { %256 = dma.done.wait [#allocation4], 128  }
  0x24   :  { %257 = vsyncadd [#allocation4], 4294967168 }
  0x25   :  { %258 = dma.done.wait [#allocation7], 512  }
  0x26   :  { %259 = vsyncadd [#allocation7], 4294966784  ;;  %vm45_vm0 = vcmask 261120   ;;  %v266_v0 = vmov 0.0|0.0   ;;  %v267_v1 = vmov 0.0   ;;  %vm268_vm1 = vmmov 0  }
  0x27   :  { %176 = vmatprep.subr.bf16.mxu0 %v266_v0  ;;  %46 = vst.msk [vmem:[#allocation2] sm:$0xff] %vm45_vm0, %v267_v1  ;;  %173 = vmatprep.mubr.msk.f32.mxu0 %vm268_vm1, %v267_v1  ;;  %v49_v2 = vld [vmem:[#allocation6] sm:$0xff]  ;;  %v50_v3 = vld [vmem:[#allocation6 + $0x8] sm:$0xff]  ;;  %v51_v4 = vld [vmem:[#allocation6 + $0x10] sm:$0xff]  ;;  %s269_s11 = smov [#allocation8]  }
  0x28   :  { %v177_v5 = vpack.c.bf16 %v50_v3, %v49_v2  ;;  %v52_v6 = vld [vmem:[#allocation6 + $0x18] sm:$0xff]  ;;  %v159_v13 = vld [vmem:[%s342_s2] ss:$0 sm:$0xff]  ;;  %s148_s12 = sshll.u32 %s269_s11, 4  ;;  %s149_s12 = int_to_ptr.vmem [resolvable:$true] %s148_s12 }
  0x29   :  { %v180_v7 = vpack.c.bf16 %v52_v6, %v51_v4  ;;  %v48_v8 = vld [vmem:[#allocation3] sm:$0xff]  ;;  %s234_s13 = scalar_lea.vmem %s149_s12, 128  ;;  %p239_p3 = scmp.lt.s32.totalorder %s149_s12, %s149_s12 }
  0x2a   :  { %178 = vmatpush3.bf16.msra.mxu0 %v177_v5  ;;  %p235_p2 = scmp.ne.s32.totalorder %s149_s12, %s234_s13  ;;  %p240_p4 = scmp.lt.s32.totalorder %s234_s13, %s234_s13 }
  0x2b   :  { %179 = vmatprep.subr.bf16.mxu0 %v266_v0 }
  0x2c   :  { %p241_p5 = por %p240_p4, %p239_p3 }
  0x2e   :  { %181 = vmatpush3.bf16.msra.mxu0 %v180_v7  ;;  %v47_v9 = vld [vmem:[#allocation2] sm:$0xff]  ;;  %p242_p6 = pnand %p241_p5, %p235_p2 }
  0x31   :  { %174 = vmatmul.mubr.msk.f32.vlgmr.msra.gmra.mrb[0].mxu0 %vm45_vm0, %v48_v8 }
 0x104   :  { %v123_v10 = vpop.f32.mrb[0].mxu0 }
 0x105   :  { %v127_v11 = vadd.f32 %v123_v10, %v47_v9  ;;  %v175_v12 = vpop.f32.mrb[1].mxu0 }
 0x107   :  { %128 = vst.msk [vmem:[#allocation2] sm:$0xff] %vm45_vm0, %v127_v11 }
 0x10e   :  { %v132_v14 = vld [vmem:[#allocation2] sm:$0xff] }
 0x10f   :  { %v140_v15 = vadd.f32 %v159_v13, %v132_v14 }
 0x111   :  { %141 = vst.msk [vmem:[#allocation8] sm:$0xff] %vm45_vm0, %v140_v15 }
 0x112   :  { %245 = shalt.err (!%p242_p6)
}
 0x113   :  { %s246_s16 = scalar_lea.hbm %s343_s3, 128 }
 0x114   :  { %p247_p7 = scmp.ne.s32.totalorder %s343_s3, %s246_s16  ;;  %p250_p8 = scmp.lt.u32.totalorder %s246_s16, %s343_s3 }
 0x116   :  { %p252_p9 = pnand %p250_p8, %p247_p7 }
 0x118   :  { %255 = shalt.err (!%p252_p9)
}
 0x119   :  { %151 = dma.vmem_to_hbm [thread:$0]  %s149_s12, 128, %s343_s3, [#allocation5]  }
 0x11a   :  { %260 = dma.done.wait [#allocation5], 128  }
 0x11b   :  { %261 = vsyncadd [#allocation5], 4294967168 }
 0x11c   :  { %155 = vsyncpa [#allocation4], 1 }
 0x11d   :  { %156 = vsyncpa [#allocation7], 1 }
 0x11e   :  { %157 = vsyncpa [#allocation5], 1 }

</bundles_post_ra>
